<compile_context>
chip_gen: v5e
topology: v5e:2x2
jax: 0.10.0
libtpu: 0.0.40
codegen_flags: <defaults>
</compile_context>

<pallas_src>
import functools

import jax
import jax.numpy as jnp
from jax import lax
from jax.experimental import pallas as pl
from jax.experimental.pallas import tpu as pltpu


# --------------------------------------------------------------------------------------
# Phase 1: dilated Conv1d (+bias, + optional activation) and per-row channel statistics.
# --------------------------------------------------------------------------------------
def _conv_stats_kernel(x_ref, w_ref, b_ref, y_ref, s1_ref, s2_ref, *,
                       kernel_size, dilation, stride, l_out, bn_first, neg_slope):
    """Per-grid-step (one batch element):

    x_ref:  (1, C_in, L_pad)   compute_dtype  VMEM
    w_ref:  (K, C_out, C_in)   compute_dtype  VMEM
    b_ref:  (C_out, 1)         f32            VMEM
    y_ref:  (1, C_out, L_out)  f32            VMEM   conv(+bias)(+act if not bn_first)
    s1_ref: (1, C_out, 1)      f32            VMEM   sum over L of y
    s2_ref: (1, C_out, 1)      f32            VMEM   sum over L of y*y
    """
    c_out = y_ref.shape[1]

    acc = jnp.zeros((c_out, l_out), jnp.float32)
    for k in range(kernel_size):                      # static, small K
        start = k * dilation                          # static offset
        if stride == 1:
            xk = x_ref[0, :, pl.ds(start, l_out)]     # (C_in, L_out) view off the ref
        else:
            # fallback path (unused for stride=1): strided window on the loaded value
            span = (l_out - 1) * stride + 1
            xk = x_ref[0, :, pl.ds(start, span)][:, ::stride]
        acc = acc + jnp.dot(w_ref[k], xk, preferred_element_type=jnp.float32)

    acc = acc + b_ref[...]                            # (C_out,1) broadcast over lanes

    if not bn_first:                                  # activation BEFORE BN stats
        acc = jnp.where(acc > 0, acc, neg_slope * acc)

    y_ref[0] = acc
    # single-pass statistics (sum, sum of squares) -> mean / var computed outside
    s1_ref[0] = jnp.sum(acc, axis=1, keepdims=True)
    s2_ref[0] = jnp.sum(acc * acc, axis=1, keepdims=True)


# --------------------------------------------------------------------------------------
# Phase 2: per-channel scale/shift (folded BatchNorm) + optional LeakyReLU.
# --------------------------------------------------------------------------------------
def _bn_act_kernel(y_ref, scale_ref, shift_ref, o_ref, *, bn_first, neg_slope):
    """y_ref/o_ref: (1, C_out, L_out) f32; scale_ref/shift_ref: (C_out, 1) f32."""
    u = y_ref[0] * scale_ref[...] + shift_ref[...]    # one FMA per element
    if bn_first:                                      # activation AFTER BN
        u = jnp.where(u > 0, u, neg_slope * u)
    o_ref[0] = u.astype(o_ref.dtype)


# --------------------------------------------------------------------------------------
# Wrapper
# --------------------------------------------------------------------------------------
def tdnn_block(x, w, b, gamma, beta, *, dilation, stride=1, padding=0,
               bn_first=True, eps=1e-5, neg_slope=0.2,
               compute_dtype=jnp.bfloat16):
    """x: (N, C_in, L) torch layout.  w: (C_out, C_in, K) torch Conv1d weight.
    Returns (N, C_out, L_out) f32, matching the PyTorch module's forward pass."""
    n, c_in, l = x.shape
    c_out, c_in_w, k = w.shape
    assert c_in_w == c_in, (c_in_w, c_in)

    if padding:
        x = jnp.pad(x, ((0, 0), (0, 0), (padding, padding)))
    l_pad = l + 2 * padding
    l_out = (l_pad - dilation * (k - 1) - 1) // stride + 1

    x_k = x.astype(compute_dtype)                               # (N, C_in, L_pad)
    w_k = jnp.transpose(w, (2, 0, 1)).astype(compute_dtype)     # (K, C_out, C_in) tiny
    b_k = b.reshape(c_out, 1).astype(jnp.float32)

    cparams = pltpu.CompilerParams(
        dimension_semantics=("parallel",),          # independent over batch -> megacore
        vmem_limit_bytes=32 * 1024 * 1024,          # explicit, safe on v5e/v6e/v7x
    )

    conv_kernel = functools.partial(
        _conv_stats_kernel, kernel_size=k, dilation=dilation, stride=stride,
        l_out=l_out, bn_first=bn_first, neg_slope=neg_slope)

    y, s1, s2 = pl.pallas_call(
        conv_kernel,
        grid=(n,),
        in_specs=[
            pl.BlockSpec((1, c_in, l_pad), lambda i: (i, 0, 0)),
            pl.BlockSpec((k, c_out, c_in), lambda i: (0, 0, 0)),
            pl.BlockSpec((c_out, 1), lambda i: (0, 0)),
        ],
        out_specs=(
            pl.BlockSpec((1, c_out, l_out), lambda i: (i, 0, 0)),
            pl.BlockSpec((1, c_out, 1), lambda i: (i, 0, 0)),
            pl.BlockSpec((1, c_out, 1), lambda i: (i, 0, 0)),
        ),
        out_shape=(
            jax.ShapeDtypeStruct((n, c_out, l_out), jnp.float32),
            jax.ShapeDtypeStruct((n, c_out, 1), jnp.float32),
            jax.ShapeDtypeStruct((n, c_out, 1), jnp.float32),
        ),
        compiler_params=cparams,
    )(x_k, w_k, b_k)

    # Global batch statistics over (N, L_out), folded into per-channel scale/shift.
    count = float(n * l_out)
    g = gamma.astype(jnp.float32)
    mean = jnp.sum(s1[:, :, 0], axis=0) / count
    var = jnp.sum(s2[:, :, 0], axis=0) / count - mean * mean
    var = jnp.maximum(var, 0.0)                     # guard against tiny negative values
    inv = lax.rsqrt(var + eps)
    scale = (g * inv).reshape(c_out, 1)
    shift = (beta.astype(jnp.float32) - g * inv * mean).reshape(c_out, 1)

    bn_kernel = functools.partial(_bn_act_kernel, bn_first=bn_first, neg_slope=neg_slope)

    out = pl.pallas_call(
        bn_kernel,
        grid=(n,),
        in_specs=[
            pl.BlockSpec((1, c_out, l_out), lambda i: (i, 0, 0)),
            pl.BlockSpec((c_out, 1), lambda i: (0, 0)),
            pl.BlockSpec((c_out, 1), lambda i: (0, 0)),
        ],
        out_specs=pl.BlockSpec((1, c_out, l_out), lambda i: (i, 0, 0)),
        out_shape=jax.ShapeDtypeStruct((n, c_out, l_out), jnp.float32),
        compiler_params=cparams,
    )(y, scale, shift)

    return out


# --------------------------------------------------------------------------------------
# Pure-JAX reference mirroring the PyTorch module (training-mode BN).
# --------------------------------------------------------------------------------------
def tdnn_block_ref(x, w, b, gamma, beta, *, dilation, stride=1, padding=0,
                   bn_first=True, eps=1e-5, neg_slope=0.2):
    y = lax.conv_general_dilated(
        x, w, window_strides=(stride,), padding=[(padding, padding)],
        rhs_dilation=(dilation,), dimension_numbers=('NCH', 'OIH', 'NCH'))
    y = y + b[None, :, None]

    def bn(z):
        mean = jnp.mean(z, axis=(0, 2), keepdims=True)
        var = jnp.mean((z - mean) ** 2, axis=(0, 2), keepdims=True)
        return (z - mean) / jnp.sqrt(var + eps) * gamma[None, :, None] + beta[None, :, None]

    def lrelu(z):
        return jnp.where(z > 0, z, neg_slope * z)

    return lrelu(bn(y)) if bn_first else bn(lrelu(y))


if __name__ == "__main__":
    # TDNN context (-2, 0, 2): kernel_size=3, effective dilation=2, padding=0, stride=1
    context = (-2, 0, 2)
    kernel_size = len(context)
    dilation = (context[-1] - context[0]) // (len(context) - 1) if kernel_size > 1 else 1

    batch, input_dim, output_dim, seq_len = 2, 16, 32, 24

    key = jax.random.PRNGKey(0)
    kx, kw, kb, kg, kbeta = jax.random.split(key, 5)
    x = jax.random.normal(kx, (batch, input_dim, seq_len), dtype=jnp.float32)
    # torch Conv1d weight layout (C_out, C_in, K)
    w = 0.1 * jax.random.normal(kw, (output_dim, input_dim, kernel_size), dtype=jnp.float32)
    b = 0.1 * jax.random.normal(kb, (output_dim,), dtype=jnp.float32)
    gamma = 1.0 + 0.1 * jax.random.normal(kg, (output_dim,), dtype=jnp.float32)
    beta = 0.1 * jax.random.normal(kbeta, (output_dim,), dtype=jnp.float32)

    ref = tdnn_block_ref(x, w, b, gamma, beta, dilation=dilation)

    # f32 MXU path: tight check against the f32 reference.
    out_f32 = jax.block_until_ready(
        tdnn_block(x, w, b, gamma, beta, dilation=dilation, compute_dtype=jnp.float32))
    assert out_f32.shape == ref.shape, (out_f32.shape, ref.shape)
    assert jnp.allclose(out_f32, ref, rtol=1e-4, atol=1e-4), \
        float(jnp.max(jnp.abs(out_f32 - ref)))

    # bf16 MXU fast path (f32 accumulation): looser tolerance vs the f32 reference.
    out_bf16 = jax.block_until_ready(
        tdnn_block(x, w, b, gamma, beta, dilation=dilation, compute_dtype=jnp.bfloat16))
    assert out_bf16.shape == ref.shape
    assert jnp.allclose(out_bf16, ref, rtol=5e-2, atol=5e-2), \
        float(jnp.max(jnp.abs(out_bf16 - ref)))

    # bn_first=False branch (activation before BN).
    ref_nb = tdnn_block_ref(x, w, b, gamma, beta, dilation=dilation, bn_first=False)
    out_nb = jax.block_until_ready(
        tdnn_block(x, w, b, gamma, beta, dilation=dilation, bn_first=False,
                   compute_dtype=jnp.float32))
    assert jnp.allclose(out_nb, ref_nb, rtol=1e-4, atol=1e-4), \
        float(jnp.max(jnp.abs(out_nb - ref_nb)))

    print("KERNEL_OK")
</pallas_src>

<mosaic_0001>
module attributes {stable_mosaic.version = 11 : i64} {
  func.func @_conv_stats_kernel(%arg0: i32, %arg1: memref<1x16x24xf32, #tpu.memory_space<vmem>>, %arg2: memref<3x32x16xf32, #tpu.memory_space<vmem>>, %arg3: memref<32x1xf32, #tpu.memory_space<vmem>>, %arg4: memref<1x32x20xf32, #tpu.memory_space<vmem>>, %arg5: memref<1x32x1xf32, #tpu.memory_space<vmem>>, %arg6: memref<1x32x1xf32, #tpu.memory_space<vmem>>) attributes {dimension_semantics = [#tpu.dimension_semantics<parallel>], iteration_bounds = array<i64: 2>, scalar_prefetch = 0 : i64, scratch_operands = 0 : i64, tpu.core_type = #tpu.core_type<tc>, window_params = [{transform_indices = @transform_0, window_bounds = array<i64: 1, 16, 24>}, {pipeline_mode = #tpu.pipeline_mode<synchronous>, transform_indices = @transform_1, window_bounds = array<i64: 3, 32, 16>}, {pipeline_mode = #tpu.pipeline_mode<synchronous>, transform_indices = @transform_2, window_bounds = array<i64: 32, 1>}, {transform_indices = @transform_3, window_bounds = array<i64: 1, 32, 20>}, {transform_indices = @transform_4, window_bounds = array<i64: 1, 32, 1>}, {transform_indices = @transform_5, window_bounds = array<i64: 1, 32, 1>}]} {
    %cst = arith.constant 0.000000e+00 : f32
    %0 = vector.broadcast %cst : f32 to vector<32x20xf32>
    %c0 = arith.constant 0 : index
    %c0_0 = arith.constant 0 : index
    %c0_1 = arith.constant 0 : index
    %1 = vector.load %arg1[%c0, %c0_0, %c0_1] : memref<1x16x24xf32, #tpu.memory_space<vmem>>, vector<1x16x20xf32>
    %2 = vector.shape_cast %1 : vector<1x16x20xf32> to vector<16x20xf32>
    %c0_2 = arith.constant 0 : index
    %c0_3 = arith.constant 0 : index
    %c0_4 = arith.constant 0 : index
    %3 = vector.load %arg2[%c0_2, %c0_3, %c0_4] : memref<3x32x16xf32, #tpu.memory_space<vmem>>, vector<1x32x16xf32>
    %4 = vector.shape_cast %3 : vector<1x32x16xf32> to vector<32x16xf32>
    %cst_5 = arith.constant dense<0.000000e+00> : vector<32x20xf32>
    %5 = tpu.matmul %4, %2, %cst_5 {dimension_numbers = #tpu.dot_dimension_numbers<[1], [0], [0], [1], [0, 0, 1, 1], [], []>} : vector<32x16xf32>, vector<16x20xf32>, vector<32x20xf32> -> vector<32x20xf32>
    %6 = arith.addf %0, %5 : vector<32x20xf32>
    %c0_6 = arith.constant 0 : index
    %c0_7 = arith.constant 0 : index
    %c2 = arith.constant 2 : index
    %7 = vector.load %arg1[%c0_6, %c0_7, %c2] : memref<1x16x24xf32, #tpu.memory_space<vmem>>, vector<1x16x20xf32>
    %8 = vector.shape_cast %7 : vector<1x16x20xf32> to vector<16x20xf32>
    %c1 = arith.constant 1 : index
    %c0_8 = arith.constant 0 : index
    %c0_9 = arith.constant 0 : index
    %9 = vector.load %arg2[%c1, %c0_8, %c0_9] : memref<3x32x16xf32, #tpu.memory_space<vmem>>, vector<1x32x16xf32>
    %10 = vector.shape_cast %9 : vector<1x32x16xf32> to vector<32x16xf32>
    %cst_10 = arith.constant dense<0.000000e+00> : vector<32x20xf32>
    %11 = tpu.matmul %10, %8, %cst_10 {dimension_numbers = #tpu.dot_dimension_numbers<[1], [0], [0], [1], [0, 0, 1, 1], [], []>} : vector<32x16xf32>, vector<16x20xf32>, vector<32x20xf32> -> vector<32x20xf32>
    %12 = arith.addf %6, %11 : vector<32x20xf32>
    %c0_11 = arith.constant 0 : index
    %c0_12 = arith.constant 0 : index
    %c4 = arith.constant 4 : index
    %13 = vector.load %arg1[%c0_11, %c0_12, %c4] : memref<1x16x24xf32, #tpu.memory_space<vmem>>, vector<1x16x20xf32>
    %14 = vector.shape_cast %13 : vector<1x16x20xf32> to vector<16x20xf32>
    %c2_13 = arith.constant 2 : index
    %c0_14 = arith.constant 0 : index
    %c0_15 = arith.constant 0 : index
    %15 = vector.load %arg2[%c2_13, %c0_14, %c0_15] : memref<3x32x16xf32, #tpu.memory_space<vmem>>, vector<1x32x16xf32>
    %16 = vector.shape_cast %15 : vector<1x32x16xf32> to vector<32x16xf32>
    %cst_16 = arith.constant dense<0.000000e+00> : vector<32x20xf32>
    %17 = tpu.matmul %16, %14, %cst_16 {dimension_numbers = #tpu.dot_dimension_numbers<[1], [0], [0], [1], [0, 0, 1, 1], [], []>} : vector<32x16xf32>, vector<16x20xf32>, vector<32x20xf32> -> vector<32x20xf32>
    %18 = arith.addf %12, %17 : vector<32x20xf32>
    %c0_17 = arith.constant 0 : index
    %c0_18 = arith.constant 0 : index
    %19 = vector.load %arg3[%c0_17, %c0_18] : memref<32x1xf32, #tpu.memory_space<vmem>>, vector<32x1xf32>
    %20 = vector.broadcast %19 : vector<32x1xf32> to vector<32x20xf32>
    %21 = arith.addf %18, %20 : vector<32x20xf32>
    %c0_19 = arith.constant 0 : index
    %c0_20 = arith.constant 0 : index
    %c0_21 = arith.constant 0 : index
    %22 = vector.load %arg4[%c0_19, %c0_20, %c0_21] : memref<1x32x20xf32, #tpu.memory_space<vmem>>, vector<1x32x20xf32>
    %23 = vector.shape_cast %22 : vector<1x32x20xf32> to vector<32x20xf32>
    %24 = vector.shape_cast %21 : vector<32x20xf32> to vector<1x32x20xf32>
    tpu.vector_store %arg4[%c0_19, %c0_20, %c0_21], %24 {strides = array<i32>} : memref<1x32x20xf32, #tpu.memory_space<vmem>>, vector<1x32x20xf32>,
    %cst_22 = arith.constant dense<0.000000e+00> : vector<32xf32>
    %25 = vector.multi_reduction <add>, %21, %cst_22 [1] : vector<32x20xf32> to vector<32xf32>
    %26 = vector.shape_cast %25 : vector<32xf32> to vector<32x1xf32>
    %c0_23 = arith.constant 0 : index
    %c0_24 = arith.constant 0 : index
    %c0_25 = arith.constant 0 : index
    %27 = vector.load %arg5[%c0_23, %c0_24, %c0_25] : memref<1x32x1xf32, #tpu.memory_space<vmem>>, vector<1x32x1xf32>
    %28 = vector.shape_cast %27 : vector<1x32x1xf32> to vector<32x1xf32>
    %29 = vector.shape_cast %26 : vector<32x1xf32> to vector<1x32x1xf32>
    tpu.vector_store %arg5[%c0_23, %c0_24, %c0_25], %29 {strides = array<i32>} : memref<1x32x1xf32, #tpu.memory_space<vmem>>, vector<1x32x1xf32>,
    %30 = arith.mulf %21, %21 : vector<32x20xf32>
    %cst_26 = arith.constant dense<0.000000e+00> : vector<32xf32>
    %31 = vector.multi_reduction <add>, %30, %cst_26 [1] : vector<32x20xf32> to vector<32xf32>
    %32 = vector.shape_cast %31 : vector<32xf32> to vector<32x1xf32>
    %c0_27 = arith.constant 0 : index
    %c0_28 = arith.constant 0 : index
    %c0_29 = arith.constant 0 : index
    %33 = vector.load %arg6[%c0_27, %c0_28, %c0_29] : memref<1x32x1xf32, #tpu.memory_space<vmem>>, vector<1x32x1xf32>
    %34 = vector.shape_cast %33 : vector<1x32x1xf32> to vector<32x1xf32>
    %35 = vector.shape_cast %32 : vector<32x1xf32> to vector<1x32x1xf32>
    tpu.vector_store %arg6[%c0_27, %c0_28, %c0_29], %35 {strides = array<i32>} : memref<1x32x1xf32, #tpu.memory_space<vmem>>, vector<1x32x1xf32>,
    return
  }
  func.func @transform_0(%arg0: i32) -> (i32, i32, i32) {
    %c0_i32 = arith.constant 0 : i32
    %c0_i32_0 = arith.constant 0 : i32
    %c0_i32_1 = arith.constant 0 : i32
    return %arg0, %c0_i32, %c0_i32_0 : i32, i32, i32
  }
  func.func @transform_1(%arg0: i32) -> (i32, i32, i32) {
    %c0_i32 = arith.constant 0 : i32
    %c0_i32_0 = arith.constant 0 : i32
    %c0_i32_1 = arith.constant 0 : i32
    %c0_i32_2 = arith.constant 0 : i32
    return %c0_i32, %c0_i32_0, %c0_i32_1 : i32, i32, i32
  }
  func.func @transform_2(%arg0: i32) -> (i32, i32) {
    %c0_i32 = arith.constant 0 : i32
    %c0_i32_0 = arith.constant 0 : i32
    %c0_i32_1 = arith.constant 0 : i32
    return %c0_i32, %c0_i32_0 : i32, i32
  }
  func.func @transform_3(%arg0: i32) -> (i32, i32, i32) {
    %c0_i32 = arith.constant 0 : i32
    %c0_i32_0 = arith.constant 0 : i32
    %c0_i32_1 = arith.constant 0 : i32
    return %arg0, %c0_i32, %c0_i32_0 : i32, i32, i32
  }
  func.func @transform_4(%arg0: i32) -> (i32, i32, i32) {
    %c0_i32 = arith.constant 0 : i32
    %c0_i32_0 = arith.constant 0 : i32
    %c0_i32_1 = arith.constant 0 : i32
    return %arg0, %c0_i32, %c0_i32_0 : i32, i32, i32
  }
  func.func @transform_5(%arg0: i32) -> (i32, i32, i32) {
    %c0_i32 = arith.constant 0 : i32
    %c0_i32_0 = arith.constant 0 : i32
    %c0_i32_1 = arith.constant 0 : i32
    return %arg0, %c0_i32, %c0_i32_0 : i32, i32, i32
  }
}

</mosaic_0001>

<bundles_post_ra>
// kernel: tpu_custom_call.1
= control target key start
LH: loop header
LB: loop body
LE: loop exit
PB: predicated region body
PF: predicated region fallthrough
CT: control target
= control target key end

     0   :  { %s709_s18 = smov 0   ;;  %s827_s0 = inlined_call_operand.vmem [shape: f32[2,16,24], index: 0, kind: input, shape index: {}]   ;;  %s828_s1 = inlined_call_operand.vmem [shape: f32[3,32,16], index: 1, kind: input, shape index: {}]   ;;  %s829_s2 = inlined_call_operand.vmem [shape: f32[32,1], index: 2, kind: input, shape index: {}]   ;;  %s830_s3 = inlined_call_operand.vmem [shape: f32[2,32,20], index: 3, kind: output, shape index: {0}]   ;;  %s831_s4 = inlined_call_operand.vmem [shape: f32[2,32,1], index: 4, kind: output, shape index: {1}]   ;;  %s832_s5 = inlined_call_operand.vmem [shape: f32[2,32,1], index: 5, kind: output, shape index: {2}]  }
   0x1 LB: > { %s599_s19 = sadd.s32 4294967295, %s674_s18   ;;  %p603_p0 = scmp.ge.s32.totalorder %s674_s18, 1  ;;  %s674_s18 = sphi %s709_s18, %s16_s18  }
   0x2   : > { %p192_p1 = scmp.lt.s32.totalorder %s674_s18, 3 }
   0x4   : > { %p193_p2 = pnand %p603_p0, %p192_p1 }
   0x5   : > { %p230_p3 = scmp.lt.s32.totalorder (!%p193_p2), %s599_s19, 1  ;;  %s676_s24 = smov (!%p193_p2), 126  }
   0x6   : > { %196 = sbr.rel (%p193_p2) target bundleno = 423 (0x1a7), region = 32  ;;  %s677_s25 = smov (!%p193_p2), 124  }
   0xb   : > { %s834_s19 = smov (!%p230_p3, %s599_s19), 1  ;;  %vm269_vm0 = vcmask 130048   ;;  %v253_v3 = vld [vmem:[%s828_s1 + $0x8] sm:$0xff]  ;;  %v408_v4 = vld [vmem:[%s829_s2] sm:$0xff]  ;;  %v254_v5 = vld [vmem:[%s828_s1 + $0x10] sm:$0xff]  ;;  %v678_v6 = vmov 0  }
   0xc   : > { %s634_s20 = sshll.u32 %s834_s19, 4  ;;  %665 = vset.pattern.permute.xlu1 %v678_v6  ;;  %666 = vset.pattern.permute.xlu2 %v678_v6  ;;  %v409_v7 = vld [vmem:[%s829_s2 + $0x8] sm:$0xff]  ;;  %v255_v8 = vld [vmem:[%s828_s1 + $0x18] sm:$0xff]  ;;  %v410_v9 = vld [vmem:[%s829_s2 + $0x10] sm:$0xff]  ;;  %s784_s10 = sshll.u32 %s834_s19, 5  ;;  %vm436_vm1 = vcmask 162816  }
   0xd   : > { %s234_s23 = scalar_lea.vmem %s827_s0, %s634_s20  ;;  %414 = vperm.xlu1 %665, %v408_v4   ;;  %667 = vset.pattern.permute.xlu0 %v678_v6  ;;  %v612_v13 = vld [vmem:[%s828_s1 + $0x20] sm:$0xff]  ;;  %v613_v14 = vld [vmem:[%s828_s1 + $0x28] sm:$0xff]  ;;  %v411_v15 = vld [vmem:[%s829_s2 + $0x18] sm:$0xff]  ;;  %s790_s13 = scalar_lea.vmem %s830_s3, %s784_s10  ;;  %vm453_vm2 = vcmask 7168  }
   0xe   : > { %v250_v0 = vld [vmem:[%s234_s23] sm:$0xff]  ;;  %v251_v1 = vld [vmem:[%s234_s23 + $0x8] sm:$0xff]  ;;  %424 = vperm.xlu2 %666, %v410_v9   ;;  %v614_v21 = vld [vmem:[%s828_s1 + $0x30] sm:$0xff]  ;;  %s244_s15 = scalar_lea.vmem %s831_s4, %s784_s10  ;;  %s249_s20 = scalar_lea.vmem %s832_s5, %s784_s10 }
   0xf   : > { %v655_v2 = vpack.i.bf16 %v250_v0, %v251_v1  ;;  %640 = vmatpush.msra.mxu1 %v251_v1  ;;  %v252_v19 = vld [vmem:[%s828_s1] sm:$0xff]  ;;  %v625_v20 = vld [vmem:[%s828_s1 + $0x48] sm:$0xff]  ;;  %v626_v23 = vld [vmem:[%s828_s1 + $0x50] sm:$0xff] }
  0x10   : > { %v624_v22 = vld [vmem:[%s828_s1 + $0x40] sm:$0xff]  ;;  %v615_v24 = vld [vmem:[%s828_s1 + $0x38] sm:$0xff] }
  0x11   : > { %656 = vrot.lane.b32.xlu0 %v655_v2, %s676_s24  ;;  %641 = vmatpush.msra.mxu1 %v250_v0  ;;  %v627_v25 = vld [vmem:[%s828_s1 + $0x58] sm:$0xff] }
  0x12   : > { %621 = vmatmul.msk.f32.vlgmr.msra.gmra.mxu1 %vm269_vm0, %v253_v3 }
  0x15   : > { %419 = vperm.xlu1 %665, %v409_v7  }
  0x16   : > { %429 = vperm.xlu2 %666, %v411_v15  }
  0x19   : > { %661 = vrot.lane.b32.xlu0 %v655_v2, %s677_s25 }
  0x1a   : > { %622 = vmatmul.msk.f32.gmra.mxu1 %vm269_vm0, %v254_v5 }
  0x22   : > { %623 = vmatmul.msk.f32.gmra.mxu1 %vm269_vm0, %v255_v8 }
  0x68   : > { %v425_v45 = vpop.permute.xlu2 %424 }
  0x70   : > { %v430_v59 = vpop.permute.xlu2 %429 }
  0x7f   : > { %v415_v27 = vpop.permute.xlu1 %414 }
  0x83   : > { %v657_v10 = vpop.permute.xlu0 %656 }
  0x84   : > { %v658_v11 = vunpack.i.l.bf16 %v657_v10  ;;  %v659_v12 = vunpack.i.h.bf16 %v657_v10 }
  0x86   : > { %296 = vmatpush.msra.mxu0 %v658_v11  ;;  %638 = vmatpush.msra.mxu3 %v658_v11 }
  0x87   : > { %v420_v32 = vpop.permute.xlu1 %419 }
  0x88   : > { %297 = vmatpush.msra.mxu0 %v659_v12  ;;  %639 = vmatpush.msra.mxu3 %v659_v12 }
  0x89   : > { %616 = vmatmul.msk.f32.vlgmr.msra.gmra.mxu0 %vm269_vm0, %v612_v13  ;;  %617 = vmatmul.msk.f32.vlgmr.msra.gmra.mxu3 %vm269_vm0, %v613_v14 }
  0x8a   : > { %337 = vmatpush.msrb.mxu0 %v251_v1 }
  0x8b   : > { %v662_v16 = vpop.permute.xlu0 %661 }
  0x8c   : > { %v663_v17 = vunpack.i.l.bf16 %v662_v16  ;;  %338 = vmatpush.msrb.mxu0 %v250_v0  ;;  %v664_v18 = vunpack.i.h.bf16 %v662_v16 }
  0x8e   : > { %389 = vmatpush.msra.mxu0 %v663_v17  ;;  %642 = vmatpush.msra.mxu2 %v663_v17 }
  0x8f   : > { %v343_v28 = vpop.f32.mrf.mxu1 }
  0x90   : > { %390 = vmatpush.msra.mxu0 %v664_v18  ;;  %643 = vmatpush.msra.mxu2 %v664_v18 }
  0x91   : > { %620 = vmatmul.msk.f32.vlgmr.msrb.gmra.mxu0 %vm269_vm0, %v252_v19  ;;  %629 = vmatmul.msk.f32.vlgmr.msra.gmra.mxu2 %vm269_vm0, %v625_v20 }
  0x92   : > { %618 = vmatmul.msk.f32.gmra.mxu3 %vm269_vm0, %v614_v21 }
  0x97   : > { %v346_v34 = vpop.f32.mrf.mxu1 }
  0x99   : > { %628 = vmatmul.msk.f32.vlgmr.msra.gmra.mxu0 %vm269_vm0, %v624_v22  ;;  %630 = vmatmul.msk.f32.gmra.mxu2 %vm269_vm0, %v626_v23 }
  0x9a   : > { %619 = vmatmul.msk.f32.gmra.mxu3 %vm269_vm0, %v615_v24 }
  0x9f   : > { %v349_v50 = vpop.f32.mrf.mxu1 }
  0xa1   : > { %631 = vmatmul.msk.f32.gmra.mxu2 %vm269_vm0, %v627_v25 }
 0x106   : > { %v299_v26 = vpop.f32.mrf.mxu0 }
 0x10c   : > { %v302_v29 = vpop.f32.mrf.mxu3 }
 0x10d   : > { %v344_v31 = vadd.f32 %v343_v28, %v302_v29 }
 0x10e   : > { %v340_v30 = vpop.f32.mrf.mxu0 }
 0x10f   : > { %v341_v35 = vadd.f32 %v340_v30, %v299_v26 }
 0x114   : > { %v395_v33 = vpop.f32.mrf.mxu2 }
 0x115   : > { %v405_v36 = vadd.f32 %v395_v33, %v344_v31  ;;  %v305_v37 = vpop.f32.mrf.mxu3 }
 0x116   : > { %v392_v38 = vpop.f32.mrf.mxu0  ;;  %v347_v42 = vadd.f32 %v346_v34, %v305_v37 }
 0x117   : > { %v433_v39 = vadd.f32 %v420_v32, %v405_v36  ;;  %v404_v40 = vadd.f32 %v392_v38, %v341_v35 }
 0x119   : > { %438 = vst.msk [vmem:[%s790_s13 + $0x8] sm:$0xff] %vm436_vm1, %v433_v39  ;;  %v432_v41 = vadd.f32 %v415_v27, %v404_v40  ;;  %v444_v43 = vsel %vm436_vm1, %v433_v39, 0.0  ;;  %v459_v48 = vmul.f32 %v433_v39, %v433_v39 }
 0x11a   : > { %445 = vadd.xlane.f32.xlu1 %v444_v43 }
 0x11b   : > { %437 = vst.msk [vmem:[%s790_s13] sm:$0xff] %vm436_vm1, %v432_v41  ;;  %v441_v44 = vsel %vm436_vm1, %v432_v41, 0.0  ;;  %v458_v52 = vmul.f32 %v432_v41, %v432_v41  ;;  %v465_v55 = vsel %vm436_vm1, %v459_v48, 0.0 }
 0x11c   : > { %v398_v46 = vpop.f32.mrf.mxu2  ;;  %442 = vadd.xlane.f32.xlu0 %v441_v44 }
 0x11d   : > { %v406_v47 = vadd.f32 %v398_v46, %v347_v42  ;;  %v308_v49 = vpop.f32.mrf.mxu3  ;;  %v462_v56 = vsel %vm436_vm1, %v458_v52, 0.0 }
 0x11e   : > { %v350_v53 = vadd.f32 %v349_v50, %v308_v49 }
 0x11f   : > { %v434_v51 = vadd.f32 %v425_v45, %v406_v47 }
 0x121   : > { %439 = vst.msk [vmem:[%s790_s13 + $0x10] sm:$0xff] %vm436_vm1, %v434_v51  ;;  %v447_v54 = vsel %vm436_vm1, %v434_v51, 0.0  ;;  %v460_v0 = vmul.f32 %v434_v51, %v434_v51 }
 0x122   : > { %448 = vadd.xlane.f32.xlu2 %v447_v54  ;;  %466 = vadd.xlane.f32.xlu1 %v465_v55 }
 0x123   : > { %v468_v1 = vsel %vm436_vm1, %v460_v0, 0.0 }
 0x124   : > { %v401_v57 = vpop.f32.mrf.mxu2  ;;  %463 = vadd.xlane.f32.xlu0 %v462_v56 }
 0x125   : > { %v407_v58 = vadd.f32 %v401_v57, %v350_v53 }
 0x127   : > { %v435_v60 = vadd.f32 %v430_v59, %v407_v58 }
 0x129   : > { %440 = vst.msk [vmem:[%s790_s13 + $0x18] sm:$0xff] %vm436_vm1, %v435_v60  ;;  %v450_v61 = vsel %vm436_vm1, %v435_v60, 0.0  ;;  %v461_v62 = vmul.f32 %v435_v60, %v435_v60 }
 0x12a   : > { %451 = vadd.xlane.f32.xlu2 %v450_v61 }
 0x12b   : > { %v471_v63 = vsel %vm436_vm1, %v461_v62, 0.0 }
 0x12c   : > { %472 = vadd.xlane.f32.xlu0 %v471_v63 }
 0x132   : > { %469 = vadd.xlane.f32.xlu2 %v468_v1 }
 0x18d   : > { %v446_v2 = vpop.xlane.xlu1 %445 }
 0x18e   : > { %455 = vst.msk [vmem:[%s244_s15 + $0x8] sm:$0xff] %vm453_vm2, %v446_v2 }
 0x18f   : > { %v443_v3 = vpop.xlane.xlu0 %442 }
 0x190   : > { %454 = vst.msk [vmem:[%s244_s15] sm:$0xff] %vm453_vm2, %v443_v3 }
 0x195   : > { %v449_v4 = vpop.xlane.xlu2 %448  ;;  %v467_v5 = vpop.xlane.xlu1 %466 }
 0x196   : > { %456 = vst.msk [vmem:[%s244_s15 + $0x10] sm:$0xff] %vm453_vm2, %v449_v4 }
 0x197   : > { %475 = vst.msk [vmem:[%s249_s20 + $0x8] sm:$0xff] %vm453_vm2, %v467_v5  ;;  %v464_v6 = vpop.xlane.xlu0 %463 }
 0x198   : > { %474 = vst.msk [vmem:[%s249_s20] sm:$0xff] %vm453_vm2, %v464_v6 }
 0x19d   : > { %v452_v7 = vpop.xlane.xlu2 %451 }
 0x19e   : > { %457 = vst.msk [vmem:[%s244_s15 + $0x18] sm:$0xff] %vm453_vm2, %v452_v7 }
 0x19f   : > { %v473_v8 = vpop.xlane.xlu0 %472 }
 0x1a0   : > { %477 = vst.msk [vmem:[%s249_s20 + $0x18] sm:$0xff] %vm453_vm2, %v473_v8 }
 0x1a5   : > { %v470_v9 = vpop.xlane.xlu2 %469 }
 0x1a6   : > { %476 = vst.msk [vmem:[%s249_s20 + $0x10] sm:$0xff] %vm453_vm2, %v470_v9 }
 0x1a7 PF: > { %s16_s18 = sadd.s32 1, %s674_s18  }
 0x1a8   : > { %p13_p4 = scmp.ge.s32.totalorder %s16_s18, 4  }
 0x1aa   :  { %15 = sbr.rel (!%p13_p4) target bundleno = 1 (0x1), region = 88 }

</bundles_post_ra>
